<compile_context>
chip_gen: v7x
topology: tpu7x:2x2x1
jax: 0.10.0
libtpu: 0.0.40
codegen_flags: <defaults>
</compile_context>

<pallas_src>
import functools

import jax
import jax.numpy as jnp
from jax.experimental import pallas as pl
from jax.experimental.pallas import tpu as pltpu


OBS_DIM = 4      # CartPole-v1 observation_space.shape = (4,)
N_ACTIONS = 2    # CartPole-v1 action_space.n = 2
H1 = 64
H2 = 32

LANE = 128       # TPU lane width; batch tiles are multiples of this
TB_MAX = 1024    # batch tile (rows per grid step); fits default scoped VMEM


def _mlp_softmax_kernel(xt_ref, w1_ref, b1_ref, w2_ref, b2_ref, w3_ref, b3_ref,
                        o_ref):
    # xt_ref : [OBS_DIM, TB]  f32   (batch on the lane axis)
    # w*_ref : bf16, torch layout [out, in]    b*_ref : f32 [out, 1]
    # o_ref  : [N_ACTIONS, TB] f32
    xt = xt_ref[...].astype(jnp.bfloat16)

    # layer1 + ReLU  (MXU bf16 matmul, f32 accumulate)
    h1 = jnp.dot(w1_ref[...], xt, preferred_element_type=jnp.float32)
    h1 = jnp.maximum(h1 + b1_ref[...], 0.0)                       # [H1, TB]

    # layer2 + ReLU
    h2 = jnp.dot(w2_ref[...], h1.astype(jnp.bfloat16),
                 preferred_element_type=jnp.float32)
    h2 = jnp.maximum(h2 + b2_ref[...], 0.0)                       # [H2, TB]

    # layer3 logits
    logits = jnp.dot(w3_ref[...], h2.astype(jnp.bfloat16),
                     preferred_element_type=jnp.float32)
    logits = logits + b3_ref[...]                                 # [2, TB]

    # 2-class softmax == sigmoid of the logit difference (no XLU reductions).
    d = logits[0:1, :] - logits[1:2, :]                           # [1, TB]
    p0 = 1.0 / (1.0 + jnp.exp(-d))
    o_ref[...] = jnp.concatenate([p0, 1.0 - p0], axis=0).astype(o_ref.dtype)


def _round_up(n, m):
    return ((n + m - 1) // m) * m


@jax.jit
def student_agent_forward(x, params):
    """x: [B, OBS_DIM] float32 -> action probabilities [B, N_ACTIONS] float32."""
    w1, b1, w2, b2, w3, b3 = params
    B = x.shape[0]

    # Pad the batch up to a lane-aligned tile grid.
    b_pad = _round_up(max(B, LANE), LANE)
    tb = min(TB_MAX, b_pad)
    b_pad = _round_up(b_pad, tb)
    n_blocks = b_pad // tb

    # batch-on-lane layout: [OBS_DIM, B_pad]  (layout plumbing outside kernel)
    xt = jnp.zeros((OBS_DIM, b_pad), jnp.float32).at[:, :B].set(x.T)

    def resident(shape):  # weights/biases: fetched once, stay in VMEM
        return pl.BlockSpec(shape, lambda i: (0, 0))

    probs_t = pl.pallas_call(
        _mlp_softmax_kernel,
        out_shape=jax.ShapeDtypeStruct((N_ACTIONS, b_pad), jnp.float32),
        grid=(n_blocks,),
        in_specs=[
            pl.BlockSpec((OBS_DIM, tb), lambda i: (0, i)),   # x tile (pipelined)
            resident((H1, OBS_DIM)), resident((H1, 1)),
            resident((H2, H1)),      resident((H2, 1)),
            resident((N_ACTIONS, H2)), resident((N_ACTIONS, 1)),
        ],
        out_specs=pl.BlockSpec((N_ACTIONS, tb), lambda i: (0, i)),
        compiler_params=pltpu.CompilerParams(
            dimension_semantics=("parallel",)),
    )(
        xt,
        w1.astype(jnp.bfloat16), b1,
        w2.astype(jnp.bfloat16), b2,
        w3.astype(jnp.bfloat16), b3,
    )

    return probs_t[:, :B].T                                      # [B, N_ACTIONS]


def init_params(key):
    """Deterministic init mimicking torch.nn.Linear's uniform(-1/sqrt(fan_in)).

    Weights are stored in torch layout [out, in]; biases as [out, 1] columns
    (broadcast over the lane/batch axis inside the kernel).
    """
    def linear(key, fan_in, fan_out):
        kw, kb = jax.random.split(key)
        bound = 1.0 / jnp.sqrt(jnp.float32(fan_in))
        w = jax.random.uniform(kw, (fan_out, fan_in), jnp.float32, -bound, bound)
        b = jax.random.uniform(kb, (fan_out, 1), jnp.float32, -bound, bound)
        return w, b

    k1, k2, k3 = jax.random.split(key, 3)
    w1, b1 = linear(k1, OBS_DIM, H1)
    w2, b2 = linear(k2, H1, H2)
    w3, b3 = linear(k3, H2, N_ACTIONS)
    return (w1, b1, w2, b2, w3, b3)


def _ref_forward(x, params):
    """Pure-JAX f32 reference (matches the PyTorch forward)."""
    w1, b1, w2, b2, w3, b3 = params
    h1 = jnp.maximum(x @ w1.T + b1[:, 0], 0.0)
    h2 = jnp.maximum(h1 @ w2.T + b2[:, 0], 0.0)
    logits = h2 @ w3.T + b3[:, 0]
    return jax.nn.softmax(logits, axis=-1)


if __name__ == "__main__":
    key = jax.random.PRNGKey(0)
    k_params, k_x = jax.random.split(key)

    params = init_params(k_params)

    B = 2
    x = jax.random.normal(k_x, (B, OBS_DIM), jnp.float32)

    probs = student_agent_forward(x, params)
    probs = jax.block_until_ready(probs)

    # sanity: valid probability distribution per row
    assert probs.shape == (B, N_ACTIONS)
    assert bool(jnp.all(jnp.isfinite(probs)))
    assert bool(jnp.allclose(jnp.sum(probs, axis=-1), 1.0, atol=1e-5))

    # loose parity with f32 reference (bf16 MXU operands => small drift)
    ref = _ref_forward(x, params)
    assert bool(jnp.allclose(probs, ref, atol=3e-2, rtol=3e-2))

    print("KERNEL_OK")
</pallas_src>

<mosaic_0001>
module attributes {stable_mosaic.version = 11 : i64} {
  func.func @_mlp_softmax_kernel(%arg0: i32, %arg1: memref<4x128xf32, #tpu.memory_space<vmem>>, %arg2: memref<64x4xbf16, #tpu.memory_space<vmem>>, %arg3: memref<64x1xf32, #tpu.memory_space<vmem>>, %arg4: memref<32x64xbf16, #tpu.memory_space<vmem>>, %arg5: memref<32x1xf32, #tpu.memory_space<vmem>>, %arg6: memref<2x32xbf16, #tpu.memory_space<vmem>>, %arg7: memref<2x1xf32, #tpu.memory_space<vmem>>, %arg8: memref<2x128xf32, #tpu.memory_space<vmem>>) attributes {dimension_semantics = [#tpu.dimension_semantics<parallel>], iteration_bounds = array<i64: 1>, scalar_prefetch = 0 : i64, scratch_operands = 0 : i64, tpu.core_type = #tpu.core_type<tc>, window_params = [{transform_indices = @transform_0, window_bounds = array<i64: 4, 128>}, {pipeline_mode = #tpu.pipeline_mode<synchronous>, transform_indices = @transform_1, window_bounds = array<i64: 64, 4>}, {pipeline_mode = #tpu.pipeline_mode<synchronous>, transform_indices = @transform_2, window_bounds = array<i64: 64, 1>}, {pipeline_mode = #tpu.pipeline_mode<synchronous>, transform_indices = @transform_3, window_bounds = array<i64: 32, 64>}, {pipeline_mode = #tpu.pipeline_mode<synchronous>, transform_indices = @transform_4, window_bounds = array<i64: 32, 1>}, {pipeline_mode = #tpu.pipeline_mode<synchronous>, transform_indices = @transform_5, window_bounds = array<i64: 2, 32>}, {pipeline_mode = #tpu.pipeline_mode<synchronous>, transform_indices = @transform_6, window_bounds = array<i64: 2, 1>}, {transform_indices = @transform_7, window_bounds = array<i64: 2, 128>}]} {
    %c0 = arith.constant 0 : index
    %c0_0 = arith.constant 0 : index
    %0 = vector.load %arg1[%c0, %c0_0] : memref<4x128xf32, #tpu.memory_space<vmem>>, vector<4x128xf32>
    %1 = arith.truncf %0 : vector<4x128xf32> to vector<4x128xbf16>
    %c0_1 = arith.constant 0 : index
    %c0_2 = arith.constant 0 : index
    %2 = vector.load %arg2[%c0_1, %c0_2] : memref<64x4xbf16, #tpu.memory_space<vmem>>, vector<64x4xbf16>
    %cst = arith.constant dense<0.000000e+00> : vector<64x128xf32>
    %3 = tpu.matmul %2, %1, %cst {dimension_numbers = #tpu.dot_dimension_numbers<[1], [0], [0], [1], [0, 0, 1, 1], [], []>} : vector<64x4xbf16>, vector<4x128xbf16>, vector<64x128xf32> -> vector<64x128xf32>
    %c0_3 = arith.constant 0 : index
    %c0_4 = arith.constant 0 : index
    %4 = vector.load %arg3[%c0_3, %c0_4] : memref<64x1xf32, #tpu.memory_space<vmem>>, vector<64x1xf32>
    %5 = vector.broadcast %4 : vector<64x1xf32> to vector<64x128xf32>
    %6 = arith.addf %3, %5 : vector<64x128xf32>
    %cst_5 = arith.constant 0.000000e+00 : f32
    %7 = vector.broadcast %cst_5 : f32 to vector<64x128xf32>
    %8 = arith.maximumf %6, %7 : vector<64x128xf32>
    %c0_6 = arith.constant 0 : index
    %c0_7 = arith.constant 0 : index
    %9 = vector.load %arg4[%c0_6, %c0_7] : memref<32x64xbf16, #tpu.memory_space<vmem>>, vector<32x64xbf16>
    %10 = arith.truncf %8 : vector<64x128xf32> to vector<64x128xbf16>
    %cst_8 = arith.constant dense<0.000000e+00> : vector<32x128xf32>
    %11 = tpu.matmul %9, %10, %cst_8 {dimension_numbers = #tpu.dot_dimension_numbers<[1], [0], [0], [1], [0, 0, 1, 1], [], []>} : vector<32x64xbf16>, vector<64x128xbf16>, vector<32x128xf32> -> vector<32x128xf32>
    %c0_9 = arith.constant 0 : index
    %c0_10 = arith.constant 0 : index
    %12 = vector.load %arg5[%c0_9, %c0_10] : memref<32x1xf32, #tpu.memory_space<vmem>>, vector<32x1xf32>
    %13 = vector.broadcast %12 : vector<32x1xf32> to vector<32x128xf32>
    %14 = arith.addf %11, %13 : vector<32x128xf32>
    %cst_11 = arith.constant 0.000000e+00 : f32
    %15 = vector.broadcast %cst_11 : f32 to vector<32x128xf32>
    %16 = arith.maximumf %14, %15 : vector<32x128xf32>
    %c0_12 = arith.constant 0 : index
    %c0_13 = arith.constant 0 : index
    %17 = vector.load %arg6[%c0_12, %c0_13] : memref<2x32xbf16, #tpu.memory_space<vmem>>, vector<2x32xbf16>
    %18 = arith.truncf %16 : vector<32x128xf32> to vector<32x128xbf16>
    %cst_14 = arith.constant dense<0.000000e+00> : vector<2x128xf32>
    %19 = tpu.matmul %17, %18, %cst_14 {dimension_numbers = #tpu.dot_dimension_numbers<[1], [0], [0], [1], [0, 0, 1, 1], [], []>} : vector<2x32xbf16>, vector<32x128xbf16>, vector<2x128xf32> -> vector<2x128xf32>
    %c0_15 = arith.constant 0 : index
    %c0_16 = arith.constant 0 : index
    %20 = vector.load %arg7[%c0_15, %c0_16] : memref<2x1xf32, #tpu.memory_space<vmem>>, vector<2x1xf32>
    %21 = vector.broadcast %20 : vector<2x1xf32> to vector<2x128xf32>
    %22 = arith.addf %19, %21 : vector<2x128xf32>
    %23 = vector.extract_strided_slice %22 {offsets = [0, 0], sizes = [1, 128], strides = [1, 1]} : vector<2x128xf32> to vector<1x128xf32>
    %24 = vector.extract_strided_slice %22 {offsets = [1, 0], sizes = [1, 128], strides = [1, 1]} : vector<2x128xf32> to vector<1x128xf32>
    %25 = arith.subf %23, %24 : vector<1x128xf32>
    %cst_17 = arith.constant 0.000000e+00 : f32
    %26 = vector.broadcast %cst_17 : f32 to vector<1x128xf32>
    %27 = arith.subf %26, %25 : vector<1x128xf32>
    %28 = math.exp %27 : vector<1x128xf32>
    %cst_18 = arith.constant 1.000000e+00 : f32
    %29 = vector.broadcast %cst_18 : f32 to vector<1x128xf32>
    %30 = arith.addf %29, %28 : vector<1x128xf32>
    %cst_19 = arith.constant 1.000000e+00 : f32
    %31 = vector.broadcast %cst_19 : f32 to vector<1x128xf32>
    %32 = arith.divf %31, %30 : vector<1x128xf32>
    %cst_20 = arith.constant 1.000000e+00 : f32
    %33 = vector.broadcast %cst_20 : f32 to vector<1x128xf32>
    %34 = arith.subf %33, %32 : vector<1x128xf32>
    %35 = tpu.concatenate %32, %34 in 0 : vector<1x128xf32>, vector<1x128xf32> -> vector<2x128xf32>
    %c0_21 = arith.constant 0 : index
    %c0_22 = arith.constant 0 : index
    %36 = vector.load %arg8[%c0_21, %c0_22] : memref<2x128xf32, #tpu.memory_space<vmem>>, vector<2x128xf32>
    tpu.vector_store %arg8[%c0_21, %c0_22], %35 {strides = array<i32>} : memref<2x128xf32, #tpu.memory_space<vmem>>, vector<2x128xf32>,
    return
  }
  func.func @transform_0(%arg0: i32) -> (i32, i32) {
    %c0_i32 = arith.constant 0 : i32
    %c0_i32_0 = arith.constant 0 : i32
    return %c0_i32, %arg0 : i32, i32
  }
  func.func @transform_1(%arg0: i32) -> (i32, i32) {
    %c0_i32 = arith.constant 0 : i32
    %c0_i32_0 = arith.constant 0 : i32
    %c0_i32_1 = arith.constant 0 : i32
    return %c0_i32, %c0_i32_0 : i32, i32
  }
  func.func @transform_2(%arg0: i32) -> (i32, i32) {
    %c0_i32 = arith.constant 0 : i32
    %c0_i32_0 = arith.constant 0 : i32
    %c0_i32_1 = arith.constant 0 : i32
    return %c0_i32, %c0_i32_0 : i32, i32
  }
  func.func @transform_3(%arg0: i32) -> (i32, i32) {
    %c0_i32 = arith.constant 0 : i32
    %c0_i32_0 = arith.constant 0 : i32
    %c0_i32_1 = arith.constant 0 : i32
    return %c0_i32, %c0_i32_0 : i32, i32
  }
  func.func @transform_4(%arg0: i32) -> (i32, i32) {
    %c0_i32 = arith.constant 0 : i32
    %c0_i32_0 = arith.constant 0 : i32
    %c0_i32_1 = arith.constant 0 : i32
    return %c0_i32, %c0_i32_0 : i32, i32
  }
  func.func @transform_5(%arg0: i32) -> (i32, i32) {
    %c0_i32 = arith.constant 0 : i32
    %c0_i32_0 = arith.constant 0 : i32
    %c0_i32_1 = arith.constant 0 : i32
    return %c0_i32, %c0_i32_0 : i32, i32
  }
  func.func @transform_6(%arg0: i32) -> (i32, i32) {
    %c0_i32 = arith.constant 0 : i32
    %c0_i32_0 = arith.constant 0 : i32
    %c0_i32_1 = arith.constant 0 : i32
    return %c0_i32, %c0_i32_0 : i32, i32
  }
  func.func @transform_7(%arg0: i32) -> (i32, i32) {
    %c0_i32 = arith.constant 0 : i32
    %c0_i32_0 = arith.constant 0 : i32
    return %c0_i32, %arg0 : i32, i32
  }
}

</mosaic_0001>

<bundles_post_ra>
// kernel: student_agent_forward.1
= control target key start
LH: loop header
LB: loop body
LE: loop exit
PB: predicated region body
PF: predicated region fallthrough
CT: control target
= control target key end

     0   :  { %vm118_vm0 = vcmask 1041408   ;;  %vm105_vm1 = vcmask 31744   ;;  %v444_v1 = vmov 0   ;;  %vm237_vm2 = vcmask 523264   ;;  %s559_s0 = inlined_call_operand.vmem [shape: f32[4,128], index: 0, kind: input, shape index: {}]   ;;  %s560_s1 = inlined_call_operand.vmem [shape: bf16[64,4], index: 1, kind: input, shape index: {}]   ;;  %s561_s2 = inlined_call_operand.vmem [shape: f32[64,1], index: 2, kind: input, shape index: {}]   ;;  %s562_s4 = inlined_call_operand.vmem [shape: f32[32,1], index: 4, kind: input, shape index: {}]   ;;  %s563_s6 = inlined_call_operand.vmem [shape: f32[2,1], index: 6, kind: input, shape index: {}]   ;;  %s564_s3 = inlined_call_operand.vmem [shape: bf16[32,64], index: 3, kind: input, shape index: {}]   ;;  %s565_s5 = inlined_call_operand.vmem [shape: bf16[2,32], index: 5, kind: input, shape index: {}]   ;;  %s566_s7 = inlined_call_operand.vmem [shape: f32[2,128], index: 7, kind: output, shape index: {}]  }
   0x1   :  { %v27_v0 = vld [vmem:[%s559_s0] sm:$0xf]  ;;  %432 = vset.pattern.permute.xlu0 %v444_v1  ;;  %433 = vset.pattern.permute.xlu1 %v444_v1  ;;  %v435_v5 = vld [vmem:[%s560_s1 + $0x8] sm:$0xff]   ;;  %v436_v6 = vld [vmem:[%s560_s1 + $0x10] sm:$0xff]   ;;  %v445_v59 = vmov 0.0   ;;  %vm446_vm3 = vmmov 0  }
   0x2   :  { %v28_v2 = vpack.c.bf16 %v27_v0, %v27_v0  ;;  %v434_v3 = vld [vmem:[%s560_s1] sm:$0xff]   ;;  %v39_v8 = vld [vmem:[%s561_s2 + $0x10] sm:$0xff]  ;;  %v38_v9 = vld [vmem:[%s561_s2 + $0x8] sm:$0xff]  ;;  %vm306_vm4 = vcmask 261120   ;;  %vm364_vm5 = vcmask 1040384  }
   0x3   :  { %400 = vmatprep.mubr.msk.bf16.mxu0 %vm105_vm1, %v434_v3  ;;  %v37_v7 = vld [vmem:[%s561_s2] sm:$0xff]  ;;  %57 = vperm.xlu1 %433, %v39_v8   ;;  %v40_v10 = vld [vmem:[%s561_s2 + $0x18] sm:$0xff]  ;;  %v42_v13 = vld [vmem:[%s561_s2 + $0x28] sm:$0xff] }
   0x4   :  { %428 = vmatprep.subr.msk.bf16.mxu0 %vm118_vm0, %v28_v2  ;;  %v120_v4 = vsel %vm118_vm0, %v28_v2, 0  ;;  %47 = vperm.xlu0 %432, %v37_v7   ;;  %v41_v11 = vld [vmem:[%s561_s2 + $0x20] sm:$0xff]  ;;  %v437_v12 = vld [vmem:[%s560_s1 + $0x18] sm:$0xff]   ;;  %v43_v14 = vld [vmem:[%s561_s2 + $0x30] sm:$0xff] }
   0x5   :  { %399 = vmatpush3.bf16.msra.mxu0 %v120_v4  ;;  %v44_v15 = vld [vmem:[%s561_s2 + $0x38] sm:$0xff]  ;;  %v203_v16 = vld [vmem:[%s562_s4] sm:$0xff]  ;;  %v204_v17 = vld [vmem:[%s562_s4 + $0x8] sm:$0xff] }
   0x6   :  { %v205_v18 = vld [vmem:[%s562_s4 + $0x10] sm:$0xff]  ;;  %v206_v19 = vld [vmem:[%s562_s4 + $0x18] sm:$0xff]  ;;  %v300_v20 = vld [vmem:[%s563_s6] sm:$0x3]  ;;  %420 = vmatprep.subr.bf16.mxu0 %v445_v59 }
   0x7   :  { %62 = vperm.xlu1 %433, %v40_v10   ;;  %v438_v21 = vld [vmem:[%s564_s3] sm:$0xff]   ;;  %v439_v58 = vld [vmem:[%s564_s3 + $0x8] sm:$0xff]  }
   0x8   :  { %401 = vmatmul.mubr.msk.bf16.vlgmr.msra.gmra.mrb[0].mxu0 %vm105_vm1, %v435_v5  ;;  %52 = vperm.xlu0 %432, %v38_v9  }
   0x9   :  { %404 = vmatprep.mubr.msk.bf16.mxu0 %vm105_vm1, %v436_v6  ;;  %416 = vmatprep.mubr.msk.bf16.mxu1 %vm237_vm2, %v438_v21 }
   0xb   :  { %72 = vperm.xlu1 %433, %v42_v13  }
   0xc   :  { %67 = vperm.xlu0 %432, %v41_v11  }
   0xf   :  { %82 = vperm.xlu1 %433, %v44_v15  }
  0x10   :  { %405 = vmatmul.mubr.msk.bf16.gmra.mrb[4].mxu0 %vm105_vm1, %v437_v12  ;;  %77 = vperm.xlu0 %432, %v43_v14   ;;  %v297_v14 = vld [vmem:[%s565_s5] sm:$0x1] }
  0x11   :  { %424 = vmatprep.mubr.msk.bf16.mxu0 %vm446_vm3, %v445_v59 }
  0x13   :  { %214 = vperm.xlu1 %433, %v204_v17  }
  0x14   :  { %209 = vperm.xlu0 %432, %v203_v16  }
  0x17   :  { %224 = vperm.xlu1 %433, %v206_v19  }
  0x18   :  { %219 = vperm.xlu0 %432, %v205_v18  }
  0x1c   :  { %303 = vperm.xlu0 %432, %v300_v20  }
  0x82   :  { %v58_v23 = vpop.permute.xlu1 %57 }
  0x83   :  { %v48_v22 = vpop.permute.xlu0 %47 }
  0x86   :  { %v63_v25 = vpop.permute.xlu1 %62 }
  0x87   :  { %v53_v24 = vpop.permute.xlu0 %52 }
  0x8a   :  { %v73_v34 = vpop.permute.xlu1 %72 }
  0x8b   :  { %v68_v29 = vpop.permute.xlu0 %67 }
  0x8e   :  { %v83_v46 = vpop.permute.xlu1 %82 }
  0x8f   :  { %v78_v41 = vpop.permute.xlu0 %77 }
  0x92   :  { %v215_v61 = vpop.permute.xlu1 %214 }
  0x93   :  { %v210_v60 = vpop.permute.xlu0 %209 }
  0x96   :  { %v225_v2 = vpop.permute.xlu1 %224 }
  0x97   :  { %v220_v62 = vpop.permute.xlu0 %219 }
  0x9b   :  { %v304_v15 = vpop.permute.xlu0 %303 }
  0xdb   :  { %v402_v26 = vpop.f32.mrb[0].mxu0 }
  0xdc   :  { %v165_v27 = vadd.f32 %v402_v26, %v58_v23  ;;  %v156_v28 = vpop.f32.mrb[1].mxu0 }
  0xdd   :  { %v157_v30 = vadd.f32 %v156_v28, %v48_v22  ;;  %v403_v31 = vpop.f32.mrb[2].mxu0 }
  0xde   :  { %v168_v32 = vadd.f32 %v403_v31, %v63_v25  ;;  %v159_v33 = vpop.f32.mrb[3].mxu0  ;;  %v189_v36 = vmax.f32 %v165_v27, 0.0 }
  0xdf   :  { %v160_v35 = vadd.f32 %v159_v33, %v53_v24  ;;  %v187_v38 = vmax.f32 %v157_v30, 0.0 }
  0xe0   :  { %v190_v37 = vmax.f32 %v168_v32, 0.0 }
  0xe1   :  { %v188_v39 = vmax.f32 %v160_v35, 0.0 }
  0xe2   :  { %v200_v40 = vpack.c.bf16 %v190_v37, %v189_v36 }
  0xe3   :  { %v406_v42 = vpop.f32.mrb[4].mxu0  ;;  %v199_v43 = vpack.c.bf16 %v188_v39, %v187_v38 }
  0xe4   :  { %v181_v44 = vadd.f32 %v406_v42, %v78_v41  ;;  %v172_v45 = vpop.f32.mrb[5].mxu0 }
  0xe5   :  { %v173_v47 = vadd.f32 %v172_v45, %v68_v29  ;;  %v407_v48 = vpop.f32.mrb[6].mxu0  ;;  %408 = vmatprep.subr.bf16.mxu1 %v199_v43 }
  0xe6   :  { %v184_v49 = vadd.f32 %v407_v48, %v83_v46  ;;  %v175_v50 = vpop.f32.mrb[7].mxu0  ;;  %409 = vmatpush3.bf16.msra.mxu1 %v199_v43  ;;  %v193_v52 = vmax.f32 %v181_v44, 0.0 }
  0xe7   :  { %v176_v51 = vadd.f32 %v175_v50, %v73_v34  ;;  %410 = vmatprep.subr.bf16.mxu1 %v200_v40  ;;  %v191_v54 = vmax.f32 %v173_v47, 0.0 }
  0xe8   :  { %v194_v53 = vmax.f32 %v184_v49, 0.0 }
  0xe9   :  { %v192_v55 = vmax.f32 %v176_v51, 0.0 }
  0xea   :  { %v202_v56 = vpack.c.bf16 %v194_v53, %v193_v52  ;;  %411 = vmatpush3.bf16.msra.mxu1 %v200_v40 }
  0xeb   :  { %v201_v57 = vpack.c.bf16 %v192_v55, %v191_v54 }
  0xed   :  { %412 = vmatprep.subr.bf16.mxu1 %v201_v57 }
  0xee   :  { %413 = vmatpush3.bf16.msra.mxu1 %v201_v57 }
  0xef   :  { %414 = vmatprep.subr.bf16.mxu1 %v202_v56 }
  0xf2   :  { %415 = vmatpush3.bf16.msra.mxu1 %v202_v56 }
  0xf5   :  { %417 = vmatmul.mubr.msk.bf16.vlgmr.msra.gmra.mrb[0].mxu1 %vm237_vm2, %v439_v58 }
 0x1c8   :  { %v418_v63 = vpop.f32.mrb[0].mxu1 }
 0x1c9   :  { %v287_v0 = vadd.f32 %v418_v63, %v220_v62  ;;  %v278_v1 = vpop.f32.mrb[1].mxu1 }
 0x1ca   :  { %v279_v3 = vadd.f32 %v278_v1, %v210_v60  ;;  %v419_v4 = vpop.f32.mrb[2].mxu1 }
 0x1cb   :  { %v290_v5 = vadd.f32 %v419_v4, %v225_v2  ;;  %v281_v6 = vpop.f32.mrb[3].mxu1  ;;  %v295_v8 = vmax.f32 %v287_v0, 0.0 }
 0x1cc   :  { %v282_v7 = vadd.f32 %v281_v6, %v215_v61  ;;  %v293_v10 = vmax.f32 %v279_v3, 0.0 }
 0x1cd   :  { %v296_v9 = vmax.f32 %v290_v5, 0.0 }
 0x1ce   :  { %v294_v11 = vmax.f32 %v282_v7, 0.0 }
 0x1cf   :  { %v299_v12 = vpack.c.bf16 %v296_v9, %v295_v8 }
 0x1d0   :  { %v298_v13 = vpack.c.bf16 %v294_v11, %v293_v10 }
 0x1d2   :  { %421 = vmatpush3.bf16.msra.mxu0 %v298_v13 }
 0x1d3   :  { %422 = vmatprep.subr.bf16.mxu0 %v445_v59 }
 0x1d6   :  { %423 = vmatpush3.bf16.msra.mxu0 %v299_v12 }
 0x1d9   :  { %425 = vmatmul.mubr.msk.bf16.vlgmr.msra.gmra.mrb[8].mxu0 %vm306_vm4, %v297_v14 }
 0x2ac   :  { %v344_v16 = vpop.f32.mrb[8].mxu0 }
 0x2ad   :  { %v345_v17 = vadd.f32 %v344_v16, %v304_v15  ;;  %v426_v18 = vpop.f32.mrb[9].mxu0 }
 0x2ae   :  { %v347_v19 = vpop.f32.mrb[10].mxu0 }
 0x2af   :  { %v351_v20 = vrot.slane %v345_v17, 1  ;;  %v427_v21 = vpop.f32.mrb[11].mxu0 }
 0x2b1   :  { %v353_v22 = vsub.f32 %v345_v17, %v351_v20 }
 0x2b3   :  { %v354_v23 = vsub.f32 0.0, %v353_v22 }
 0x2b5   :  { %v355_v24 = vmul.f32 1.442695, %v354_v23 }
 0x2b7   :  { %440 = vpow2.f32 %v355_v24 }
 0x2c1   :  { %v441_v25 = vpop.eup %440 }
 0x2c2   :  { %v357_v26 = vadd.f32 1.0, %v441_v25 }
 0x2c4   :  { %442 = vrcp.f32 %v357_v26 }
 0x2ce   :  { %v443_v27 = vpop.eup %442 }
 0x2cf   :  { %v360_v28 = vsub.f32 1.0, %v443_v27 }
 0x2d1   :  { %v362_v29 = vrot.slane %v360_v28, 7 }
 0x2d3   :  { %v365_v30 = vsel %vm364_vm5, %v443_v27, %v362_v29 }
 0x2d4   :  { %366 = vst [vmem:[%s566_s7] sm:$0x3] %v365_v30 }

</bundles_post_ra>
